<compile_context>
chip_gen: v7x
topology: tpu7x:2x2x1
jax: 0.10.0
libtpu: 0.0.40
codegen_flags: <defaults>
</compile_context>

<pallas_src>
import functools

import jax
import jax.numpy as jnp
from jax import lax
from jax.experimental import pallas as pl
from jax.experimental.pallas import tpu as pltpu

N = 2             # batch
IMG = 64          # input spatial size      (original 448)
C = 128           # conv5 feature channels  (original 512)
D = 256           # bilinear projection dim (original 8192)
NUM_CLASSES = 16  # original 200
BN_EPS = 1e-5

TILE_D = min(D, 512)      # small D tile: bounds proj temp / weight buffers (v7x/v5e)
assert D % TILE_D == 0


# ----------------------------- Pallas kernel -------------------------------

def _hbp_kernel(f_ref, w_ref, b_ref, z_ref, *, num_samples, npos):
    """Fused 1x1-conv projection (BN folded) + ReLU + bilinear pooling.

    Grid = (D tiles,); every tile writes a distinct output block ("parallel").

    f_ref : (N*3P, C)    bf16  conv5_1/_2/_3 features, per-sample [f1;f2;f3]
    w_ref : (C, TILE_D)  bf16  1x1-conv weight with BN scale folded in
    b_ref : (1, TILE_D)  f32   folded BN bias
    z_ref : (3N, TILE_D) f32   un-normalized bilinear vectors
                               rows per sample: [p1*p2, p2*p3, p1*p3]
    """
    # One stacked MXU matmul for all samples and all three feature maps.
    proj = jnp.dot(f_ref[...], w_ref[...], preferred_element_type=jnp.float32)
    proj = jnp.maximum(proj + b_ref[...], 0.0)        # folded-BN bias + ReLU

    for s in range(num_samples):                      # static, small N
        off = s * 3 * npos
        p1 = proj[off:off + npos]
        p2 = proj[off + npos:off + 2 * npos]
        p3 = proj[off + 2 * npos:off + 3 * npos]
        # Bilinear pooling: elementwise product + spatial sum, sqrt(x + 1e-5).
        z12 = jnp.sqrt(jnp.sum(p1 * p2, axis=0, keepdims=True) + 1e-5)
        z23 = jnp.sqrt(jnp.sum(p2 * p3, axis=0, keepdims=True) + 1e-5)
        z13 = jnp.sqrt(jnp.sum(p1 * p3, axis=0, keepdims=True) + 1e-5)
        r = 3 * s
        z_ref[r:r + 1, :] = z12
        z_ref[r + 1:r + 2, :] = z23
        z_ref[r + 2:r + 3, :] = z13


def _vmem_limit_bytes(n3p, c, tile_d, n_rows):
    """Size the scoped-VMEM limit to the real working set (with margin)."""
    f_b = n3p * c * 2              # bf16 feature block (resident across D tiles)
    w_b = c * tile_d * 2           # bf16 weight tile
    bias_b = tile_d * 4
    out_b = n_rows * tile_d * 4
    proj_b = n3p * tile_d * 4      # f32 projection temporary
    est = 2 * (f_b + w_b + bias_b + out_b) + 2 * proj_b + (2 << 20)
    return int(min(max(est, 32 << 20), 56 << 20))


def hbp_pallas(f_all, w_scaled, bn_bias, *, num_samples, npos, tile_d=TILE_D):
    """f_all: (N*3P, C) bf16; w_scaled: (C, D) bf16; bn_bias: (1, D) f32
    -> z: (3N, D) f32 (un-normalized bilinear vectors)."""
    n3p, c = f_all.shape
    d = w_scaled.shape[1]
    assert n3p == num_samples * 3 * npos
    assert d % tile_d == 0
    n_dt = d // tile_d
    n_rows = num_samples * 3

    kernel = functools.partial(_hbp_kernel, num_samples=num_samples, npos=npos)
    return pl.pallas_call(
        kernel,
        out_shape=jax.ShapeDtypeStruct((n_rows, d), jnp.float32),
        grid_spec=pltpu.PrefetchScalarGridSpec(
            num_scalar_prefetch=0,
            grid=(n_dt,),
            in_specs=[
                # features: resident across D tiles (index_map ignores dt)
                pl.BlockSpec((n3p, c), lambda dt: (0, 0)),
                pl.BlockSpec((c, tile_d), lambda dt: (0, dt)),
                pl.BlockSpec((1, tile_d), lambda dt: (0, dt)),
            ],
            out_specs=pl.BlockSpec((n_rows, tile_d), lambda dt: (0, dt)),
        ),
        compiler_params=pltpu.CompilerParams(
            dimension_semantics=("parallel",),
            vmem_limit_bytes=_vmem_limit_bytes(n3p, c, tile_d, n_rows)),
    )(f_all, w_scaled, bn_bias)


# --------------------------- backbone glue (JAX) ---------------------------
# TODO(synk): the pretrained VGG16 3x3-conv backbone stays in lax.conv glue;
# the Pallas kernel covers the HBP projection / pooling; normalize + fc are
# tiny and run in XLA (de-fused per the performance review).

def conv3x3(x, w):  # x: NHWC, w: HWIO
    return lax.conv_general_dilated(
        x, w, window_strides=(1, 1), padding="SAME",
        dimension_numbers=("NHWC", "HWIO", "NHWC"))


def maxpool2(x):
    return lax.reduce_window(x, -jnp.inf, lax.max,
                             (1, 2, 2, 1), (1, 2, 2, 1), "VALID")


def init_params(key):
    keys = jax.random.split(key, 12)
    chans = [3, 16, 32, 64, C]
    backbone = [
        0.05 * jax.random.normal(keys[i], (3, 3, chans[i], chans[i + 1]), jnp.float32)
        for i in range(4)
    ]
    return dict(
        backbone=backbone,
        w5_1=0.05 * jax.random.normal(keys[4], (3, 3, C, C), jnp.float32),
        w5_2=0.05 * jax.random.normal(keys[5], (3, 3, C, C), jnp.float32),
        w5_3=0.05 * jax.random.normal(keys[6], (3, 3, C, C), jnp.float32),
        # single shared Conv2d(C, D, 1, bias=False), as in the reference module
        w_proj=0.05 * jax.random.normal(keys[7], (C, D), jnp.float32),
        bn_gamma=1.0 + 0.01 * jax.random.normal(keys[8], (D,), jnp.float32),
        bn_beta=0.01 * jax.random.normal(keys[9], (D,), jnp.float32),
        bn_mean=0.01 * jax.random.normal(keys[10], (D,), jnp.float32),
        bn_var=jnp.ones((D,), jnp.float32),
        fc_w=0.05 * jax.random.normal(keys[11], (3 * D, NUM_CLASSES), jnp.float32),
        fc_b=jnp.zeros((NUM_CLASSES,), jnp.float32),
    )


def hbp_forward(params, x_nchw):
    # NCHW (PyTorch convention) -> NHWC for the backbone
    x = jnp.transpose(x_nchw, (0, 2, 3, 1))

    # VGG-like feature extractor: 4 x (conv3x3 + ReLU + maxpool2) -> (N,4,4,C)
    for w in params["backbone"]:
        x = jax.nn.relu(conv3x3(x, w))
        x = maxpool2(x)

    # features_conv5_1 / _2 / _3 : conv3x3 + ReLU each
    f1 = jax.nn.relu(conv3x3(x, params["w5_1"]))
    f2 = jax.nn.relu(conv3x3(f1, params["w5_2"]))
    f3 = jax.nn.relu(conv3x3(f2, params["w5_3"]))

    n, h, w_, c = f1.shape
    p = h * w_
    # stack the three feature maps per sample along M: (N*3P, C), bf16 for MXU
    f_all = jnp.concatenate(
        [f1.reshape(n, p, c), f2.reshape(n, p, c), f3.reshape(n, p, c)],
        axis=1).reshape(n * 3 * p, c).astype(jnp.bfloat16)

    # fold eval-mode BatchNorm: scale into the weight, bias stays in-kernel
    scale = params["bn_gamma"] * lax.rsqrt(params["bn_var"] + BN_EPS)
    bn_bias = (params["bn_beta"] - params["bn_mean"] * scale
               ).reshape(1, D).astype(jnp.float32)
    w_scaled = (params["w_proj"] * scale[None, :]).astype(jnp.bfloat16)

    # Pallas: projection + bilinear pooling -> un-normalized z (3N, D)
    z = hbp_pallas(f_all, w_scaled, bn_bias, num_samples=n, npos=p)
    z = z.reshape(n, 3, D)

    # F.normalize per branch (eps=1e-12 clamp inert: z >= sqrt(1e-5)),
    # then the tiny Linear — both in XLA (de-fused per perf review).
    z = z * lax.rsqrt(jnp.sum(z * z, axis=-1, keepdims=True))
    x_branch = z.reshape(n, 3 * D)      # cat order [p1*p2, p2*p3, p1*p3]
    return x_branch @ params["fc_w"] + params["fc_b"]


if __name__ == "__main__":
    key = jax.random.PRNGKey(0)
    pkey, xkey = jax.random.split(key)
    params = init_params(pkey)
    x = jax.random.normal(xkey, (N, 3, IMG, IMG), dtype=jnp.float32)

    fwd = jax.jit(lambda xx: hbp_forward(params, xx))
    out = fwd(x)
    jax.block_until_ready(out)
    assert out.shape == (N, NUM_CLASSES), out.shape
    assert out.dtype == jnp.float32
    print("KERNEL_OK")
</pallas_src>

<mosaic_0001>
module attributes {stable_mosaic.version = 11 : i64} {
  func.func @_hbp_kernel(%arg0: i32, %arg1: memref<96x128xbf16, #tpu.memory_space<vmem>>, %arg2: memref<128x256xbf16, #tpu.memory_space<vmem>>, %arg3: memref<1x256xf32, #tpu.memory_space<vmem>>, %arg4: memref<6x256xf32, #tpu.memory_space<vmem>>) attributes {dimension_semantics = [#tpu.dimension_semantics<parallel>], iteration_bounds = array<i64: 1>, scalar_prefetch = 0 : i64, scratch_operands = 0 : i64, tpu.core_type = #tpu.core_type<tc>, window_params = [{pipeline_mode = #tpu.pipeline_mode<synchronous>, transform_indices = @transform_0, window_bounds = array<i64: 96, 128>}, {transform_indices = @transform_1, window_bounds = array<i64: 128, 256>}, {transform_indices = @transform_2, window_bounds = array<i64: 1, 256>}, {transform_indices = @transform_3, window_bounds = array<i64: 6, 256>}]} {
    %c0 = arith.constant 0 : index
    %c0_0 = arith.constant 0 : index
    %0 = vector.load %arg1[%c0, %c0_0] : memref<96x128xbf16, #tpu.memory_space<vmem>>, vector<96x128xbf16>
    %c0_1 = arith.constant 0 : index
    %c0_2 = arith.constant 0 : index
    %1 = vector.load %arg2[%c0_1, %c0_2] : memref<128x256xbf16, #tpu.memory_space<vmem>>, vector<128x256xbf16>
    %cst = arith.constant dense<0.000000e+00> : vector<96x256xf32>
    %2 = tpu.matmul %0, %1, %cst {dimension_numbers = #tpu.dot_dimension_numbers<[1], [0], [0], [1], [0, 0, 1, 1], [], []>} : vector<96x128xbf16>, vector<128x256xbf16>, vector<96x256xf32> -> vector<96x256xf32>
    %c0_3 = arith.constant 0 : index
    %c0_4 = arith.constant 0 : index
    %3 = vector.load %arg3[%c0_3, %c0_4] : memref<1x256xf32, #tpu.memory_space<vmem>>, vector<1x256xf32>
    %4 = vector.broadcast %3 : vector<1x256xf32> to vector<96x256xf32>
    %5 = arith.addf %2, %4 : vector<96x256xf32>
    %cst_5 = arith.constant 0.000000e+00 : f32
    %6 = vector.broadcast %cst_5 : f32 to vector<96x256xf32>
    %7 = arith.maximumf %5, %6 : vector<96x256xf32>
    %8 = vector.extract_strided_slice %7 {offsets = [0, 0], sizes = [16, 256], strides = [1, 1]} : vector<96x256xf32> to vector<16x256xf32>
    %9 = vector.extract_strided_slice %7 {offsets = [16, 0], sizes = [16, 256], strides = [1, 1]} : vector<96x256xf32> to vector<16x256xf32>
    %10 = vector.extract_strided_slice %7 {offsets = [32, 0], sizes = [16, 256], strides = [1, 1]} : vector<96x256xf32> to vector<16x256xf32>
    %11 = arith.mulf %8, %9 : vector<16x256xf32>
    %cst_6 = arith.constant dense<0.000000e+00> : vector<256xf32>
    %12 = vector.multi_reduction <add>, %11, %cst_6 [0] : vector<16x256xf32> to vector<256xf32>
    %13 = vector.shape_cast %12 : vector<256xf32> to vector<1x256xf32>
    %cst_7 = arith.constant 9.99999974E-6 : f32
    %14 = vector.broadcast %cst_7 : f32 to vector<1x256xf32>
    %15 = arith.addf %13, %14 : vector<1x256xf32>
    %16 = math.sqrt %15 : vector<1x256xf32>
    %17 = arith.mulf %9, %10 : vector<16x256xf32>
    %cst_8 = arith.constant dense<0.000000e+00> : vector<256xf32>
    %18 = vector.multi_reduction <add>, %17, %cst_8 [0] : vector<16x256xf32> to vector<256xf32>
    %19 = vector.shape_cast %18 : vector<256xf32> to vector<1x256xf32>
    %cst_9 = arith.constant 9.99999974E-6 : f32
    %20 = vector.broadcast %cst_9 : f32 to vector<1x256xf32>
    %21 = arith.addf %19, %20 : vector<1x256xf32>
    %22 = math.sqrt %21 : vector<1x256xf32>
    %23 = arith.mulf %8, %10 : vector<16x256xf32>
    %cst_10 = arith.constant dense<0.000000e+00> : vector<256xf32>
    %24 = vector.multi_reduction <add>, %23, %cst_10 [0] : vector<16x256xf32> to vector<256xf32>
    %25 = vector.shape_cast %24 : vector<256xf32> to vector<1x256xf32>
    %cst_11 = arith.constant 9.99999974E-6 : f32
    %26 = vector.broadcast %cst_11 : f32 to vector<1x256xf32>
    %27 = arith.addf %25, %26 : vector<1x256xf32>
    %28 = math.sqrt %27 : vector<1x256xf32>
    %c0_12 = arith.constant 0 : index
    %c0_13 = arith.constant 0 : index
    %29 = vector.load %arg4[%c0_12, %c0_13] : memref<6x256xf32, #tpu.memory_space<vmem>>, vector<1x256xf32>
    tpu.vector_store %arg4[%c0_12, %c0_13], %16 {strides = array<i32>} : memref<6x256xf32, #tpu.memory_space<vmem>>, vector<1x256xf32>,
    %c1 = arith.constant 1 : index
    %c0_14 = arith.constant 0 : index
    %30 = vector.load %arg4[%c1, %c0_14] : memref<6x256xf32, #tpu.memory_space<vmem>>, vector<1x256xf32>
    tpu.vector_store %arg4[%c1, %c0_14], %22 {strides = array<i32>} : memref<6x256xf32, #tpu.memory_space<vmem>>, vector<1x256xf32>,
    %c2 = arith.constant 2 : index
    %c0_15 = arith.constant 0 : index
    %31 = vector.load %arg4[%c2, %c0_15] : memref<6x256xf32, #tpu.memory_space<vmem>>, vector<1x256xf32>
    tpu.vector_store %arg4[%c2, %c0_15], %28 {strides = array<i32>} : memref<6x256xf32, #tpu.memory_space<vmem>>, vector<1x256xf32>,
    %32 = vector.extract_strided_slice %7 {offsets = [48, 0], sizes = [16, 256], strides = [1, 1]} : vector<96x256xf32> to vector<16x256xf32>
    %33 = vector.extract_strided_slice %7 {offsets = [64, 0], sizes = [16, 256], strides = [1, 1]} : vector<96x256xf32> to vector<16x256xf32>
    %34 = vector.extract_strided_slice %7 {offsets = [80, 0], sizes = [16, 256], strides = [1, 1]} : vector<96x256xf32> to vector<16x256xf32>
    %35 = arith.mulf %32, %33 : vector<16x256xf32>
    %cst_16 = arith.constant dense<0.000000e+00> : vector<256xf32>
    %36 = vector.multi_reduction <add>, %35, %cst_16 [0] : vector<16x256xf32> to vector<256xf32>
    %37 = vector.shape_cast %36 : vector<256xf32> to vector<1x256xf32>
    %cst_17 = arith.constant 9.99999974E-6 : f32
    %38 = vector.broadcast %cst_17 : f32 to vector<1x256xf32>
    %39 = arith.addf %37, %38 : vector<1x256xf32>
    %40 = math.sqrt %39 : vector<1x256xf32>
    %41 = arith.mulf %33, %34 : vector<16x256xf32>
    %cst_18 = arith.constant dense<0.000000e+00> : vector<256xf32>
    %42 = vector.multi_reduction <add>, %41, %cst_18 [0] : vector<16x256xf32> to vector<256xf32>
    %43 = vector.shape_cast %42 : vector<256xf32> to vector<1x256xf32>
    %cst_19 = arith.constant 9.99999974E-6 : f32
    %44 = vector.broadcast %cst_19 : f32 to vector<1x256xf32>
    %45 = arith.addf %43, %44 : vector<1x256xf32>
    %46 = math.sqrt %45 : vector<1x256xf32>
    %47 = arith.mulf %32, %34 : vector<16x256xf32>
    %cst_20 = arith.constant dense<0.000000e+00> : vector<256xf32>
    %48 = vector.multi_reduction <add>, %47, %cst_20 [0] : vector<16x256xf32> to vector<256xf32>
    %49 = vector.shape_cast %48 : vector<256xf32> to vector<1x256xf32>
    %cst_21 = arith.constant 9.99999974E-6 : f32
    %50 = vector.broadcast %cst_21 : f32 to vector<1x256xf32>
    %51 = arith.addf %49, %50 : vector<1x256xf32>
    %52 = math.sqrt %51 : vector<1x256xf32>
    %c3 = arith.constant 3 : index
    %c0_22 = arith.constant 0 : index
    %53 = vector.load %arg4[%c3, %c0_22] : memref<6x256xf32, #tpu.memory_space<vmem>>, vector<1x256xf32>
    tpu.vector_store %arg4[%c3, %c0_22], %40 {strides = array<i32>} : memref<6x256xf32, #tpu.memory_space<vmem>>, vector<1x256xf32>,
    %c4 = arith.constant 4 : index
    %c0_23 = arith.constant 0 : index
    %54 = vector.load %arg4[%c4, %c0_23] : memref<6x256xf32, #tpu.memory_space<vmem>>, vector<1x256xf32>
    tpu.vector_store %arg4[%c4, %c0_23], %46 {strides = array<i32>} : memref<6x256xf32, #tpu.memory_space<vmem>>, vector<1x256xf32>,
    %c5 = arith.constant 5 : index
    %c0_24 = arith.constant 0 : index
    %55 = vector.load %arg4[%c5, %c0_24] : memref<6x256xf32, #tpu.memory_space<vmem>>, vector<1x256xf32>
    tpu.vector_store %arg4[%c5, %c0_24], %52 {strides = array<i32>} : memref<6x256xf32, #tpu.memory_space<vmem>>, vector<1x256xf32>,
    return
  }
  func.func @transform_0(%arg0: i32) -> (i32, i32) {
    %c0_i32 = arith.constant 0 : i32
    %c0_i32_0 = arith.constant 0 : i32
    %c0_i32_1 = arith.constant 0 : i32
    return %c0_i32, %c0_i32_0 : i32, i32
  }
  func.func @transform_1(%arg0: i32) -> (i32, i32) {
    %c0_i32 = arith.constant 0 : i32
    %c0_i32_0 = arith.constant 0 : i32
    return %c0_i32, %arg0 : i32, i32
  }
  func.func @transform_2(%arg0: i32) -> (i32, i32) {
    %c0_i32 = arith.constant 0 : i32
    %c0_i32_0 = arith.constant 0 : i32
    return %c0_i32, %arg0 : i32, i32
  }
  func.func @transform_3(%arg0: i32) -> (i32, i32) {
    %c0_i32 = arith.constant 0 : i32
    %c0_i32_0 = arith.constant 0 : i32
    return %c0_i32, %arg0 : i32, i32
  }
}

</mosaic_0001>

<bundles_post_ra>
// kernel: _lambda_.1
= control target key start
LH: loop header
LB: loop body
LE: loop exit
PB: predicated region body
PF: predicated region fallthrough
CT: control target
= control target key end

     0   :  { %v724_v1 = vmov 0   ;;  %v45_v23 = vlaneseq  ;;  %s1080_s1 = inlined_call_operand.vmem [shape: bf16[128,256], index: 1, kind: input, shape index: {}]   ;;  %s1081_s0 = inlined_call_operand.vmem [shape: bf16[96,128], index: 0, kind: input, shape index: {}]   ;;  %s1082_s2 = inlined_call_operand.vmem [shape: f32[1,256], index: 2, kind: input, shape index: {}]   ;;  %s1083_s3 = inlined_call_operand.vmem [shape: f32[6,256], index: 3, kind: output, shape index: {}]  }
   0x1   :  { %v670_v0 = vld [vmem:[%s1080_s1 + $0x4] ss:$8 sps:$4 sm:$0xff]   ;;  %203 = vmatprep.mubr.bf16.mxu0 %v724_v1  ;;  %233 = vmatprep.mubr.bf16.mxu1 %v724_v1  ;;  %v672_v2 = vld [vmem:[%s1080_s1] ss:$8 sps:$4 sm:$0xff]   ;;  %v673_v3 = vld [vmem:[%s1080_s1 + $0x14] ss:$8 sps:$4 sm:$0xff]  }
   0x2   :  { %171 = vmatprep.subr.bf16.mxu0 %v670_v0  ;;  %652 = vmatprep.subr.bf16.mxu1 %v670_v0  ;;  %v675_v4 = vld [vmem:[%s1080_s1 + $0x10] ss:$8 sps:$4 sm:$0xff]   ;;  %v676_v5 = vld [vmem:[%s1080_s1 + $0x24] ss:$8 sps:$4 sm:$0xff]   ;;  %v678_v6 = vld [vmem:[%s1080_s1 + $0x20] ss:$8 sps:$4 sm:$0xff]  }
   0x3   :  { %172 = vmatpush1.bf16.msra.mxu0 %v672_v2  ;;  %660 = vmatpush1.bf16.msra.mxu1 %v672_v2  ;;  %v679_v7 = vld [vmem:[%s1080_s1 + $0x34] ss:$8 sps:$4 sm:$0xff]   ;;  %v681_v8 = vld [vmem:[%s1080_s1 + $0x30] ss:$8 sps:$4 sm:$0xff]   ;;  %v682_v9 = vld [vmem:[%s1080_s1 + $0x44] ss:$8 sps:$4 sm:$0xff]  }
   0x4   :  { %173 = vmatprep.subr.bf16.mxu0 %v673_v3  ;;  %653 = vmatprep.subr.bf16.mxu1 %v673_v3  ;;  %v684_v10 = vld [vmem:[%s1080_s1 + $0x40] ss:$8 sps:$4 sm:$0xff]   ;;  %v685_v11 = vld [vmem:[%s1080_s1 + $0x54] ss:$8 sps:$4 sm:$0xff]   ;;  %v687_v12 = vld [vmem:[%s1080_s1 + $0x50] ss:$8 sps:$4 sm:$0xff]  }
   0x5   :  { %v688_v13 = vld [vmem:[%s1080_s1 + $0x64] ss:$8 sps:$4 sm:$0xff]   ;;  %v690_v14 = vld [vmem:[%s1080_s1 + $0x60] ss:$8 sps:$4 sm:$0xff]   ;;  %v691_v15 = vld [vmem:[%s1080_s1 + $0x74] ss:$8 sps:$4 sm:$0xff]  }
   0x6   :  { %v693_v16 = vld [vmem:[%s1080_s1 + $0x70] ss:$8 sps:$4 sm:$0xff]   ;;  %v694_v17 = vld [vmem:[%s1081_s0] sm:$0xff]   ;;  %v696_v19 = vld [vmem:[%s1081_s0 + $0x8] sm:$0xff]   ;;  %v813_v24 = vshrl.u32 %v45_v23, 7  ;;  %vm1000_vm8 = vcmp.lt.s32.totalorder %v45_v23, 256 }
   0x7   :  { %174 = vmatpush1.bf16.msra.mxu0 %v675_v4  ;;  %661 = vmatpush1.bf16.msra.mxu1 %v675_v4  ;;  %v695_v18 = vld [vmem:[%s1081_s0 + $0x18] sm:$0xff]   ;;  %v697_v20 = vld [vmem:[%s1081_s0 + $0x20] sm:$0xff]   ;;  %v698_v21 = vld [vmem:[%s1081_s0 + $0x10] sm:$0xff]  }
   0x8   :  { %175 = vmatprep.subr.bf16.mxu0 %v676_v5  ;;  %654 = vmatprep.subr.bf16.mxu1 %v676_v5  ;;  %v699_v22 = vld [vmem:[%s1081_s0 + $0x28] sm:$0xff]   ;;  %v47_v25 = vsub.s32 0, %v813_v24  ;;  %v51_v26 = vsub.s32 1, %v813_v24  ;;  %v43_v27 = vld [vmem:[%s1082_s2] sm:$0x3] }
   0xa   :  { %v820_v28 = vrot.slane %v43_v27, %v47_v25  ;;  %v822_v31 = vrot.slane %v43_v27, %v51_v26 }
   0xb   :  { %176 = vmatpush1.bf16.msra.mxu0 %v678_v6  ;;  %662 = vmatpush1.bf16.msra.mxu1 %v678_v6 }
   0xc   :  { %177 = vmatprep.subr.bf16.mxu0 %v679_v7  ;;  %655 = vmatprep.subr.bf16.mxu1 %v679_v7 }
   0xf   :  { %178 = vmatpush1.bf16.msra.mxu0 %v681_v8  ;;  %663 = vmatpush1.bf16.msra.mxu1 %v681_v8 }
  0x10   :  { %179 = vmatprep.subr.bf16.mxu0 %v682_v9  ;;  %656 = vmatprep.subr.bf16.mxu1 %v682_v9 }
  0x13   :  { %180 = vmatpush1.bf16.msra.mxu0 %v684_v10  ;;  %664 = vmatpush1.bf16.msra.mxu1 %v684_v10 }
  0x14   :  { %181 = vmatprep.subr.bf16.mxu0 %v685_v11  ;;  %657 = vmatprep.subr.bf16.mxu1 %v685_v11 }
  0x17   :  { %182 = vmatpush1.bf16.msra.mxu0 %v687_v12  ;;  %665 = vmatpush1.bf16.msra.mxu1 %v687_v12 }
  0x18   :  { %183 = vmatprep.subr.bf16.mxu0 %v688_v13  ;;  %658 = vmatprep.subr.bf16.mxu1 %v688_v13 }
  0x1b   :  { %184 = vmatpush1.bf16.msra.mxu0 %v690_v14  ;;  %666 = vmatpush1.bf16.msra.mxu1 %v690_v14 }
  0x1c   :  { %185 = vmatprep.subr.bf16.mxu0 %v691_v15  ;;  %659 = vmatprep.subr.bf16.mxu1 %v691_v15 }
  0x1f   :  { %186 = vmatpush1.bf16.msra.mxu0 %v693_v16  ;;  %667 = vmatpush1.bf16.msra.mxu1 %v693_v16 }
  0x22   :  { %204 = vmatmul.mubr.bf16.vlgmr.msra.gmra.mrb[0].mxu0 %v694_v17  ;;  %234 = vmatmul.mubr.bf16.vlgmr.msra.gmra.mrb[0].mxu1 %v695_v18 }
  0x23   :  { %213 = vmatprep.mubr.bf16.mxu0 %v724_v1  ;;  %243 = vmatprep.mubr.bf16.mxu1 %v724_v1 }
  0x2a   :  { %214 = vmatmul.mubr.bf16.gmra.mrb[4].mxu0 %v696_v19  ;;  %244 = vmatmul.mubr.bf16.gmra.mrb[4].mxu1 %v697_v20  ;;  %v725_v20 = vmov 1966171168  }
  0x2b   :  { %223 = vmatprep.mubr.bf16.mxu0 %v724_v1  ;;  %253 = vmatprep.mubr.bf16.mxu1 %v724_v1 }
  0x32   :  { %224 = vmatmul.mubr.bf16.gmra.mrb[8].mxu0 %v698_v21  ;;  %254 = vmatmul.mubr.bf16.gmra.mrb[8].mxu1 %v699_v22  ;;  %v901_v21 = vunpack.c.l.s4 %v725_v20 }
  0xf5   :  { %v205_v29 = vpop.f32.mrb[0].mxu0  ;;  %v235_v30 = vpop.f32.mrb[0].mxu1 }
  0xf6   :  { %v207_v32 = vpop.f32.mrb[1].mxu0  ;;  %v237_v33 = vpop.f32.mrb[1].mxu1  ;;  %v825_v38 = vadd.f32 %v205_v29, %v820_v28  ;;  %v828_v39 = vadd.f32 %v235_v30, %v820_v28 }
  0xf7   :  { %v209_v34 = vpop.f32.mrb[2].mxu0  ;;  %v239_v35 = vpop.f32.mrb[2].mxu1  ;;  %v831_v40 = vadd.f32 %v207_v32, %v822_v31  ;;  %v834_v41 = vadd.f32 %v237_v33, %v822_v31 }
  0xf8   :  { %v211_v36 = vpop.f32.mrb[3].mxu0  ;;  %v241_v37 = vpop.f32.mrb[3].mxu1  ;;  %v837_v42 = vadd.f32 %v209_v34, %v820_v28  ;;  %v840_v43 = vadd.f32 %v239_v35, %v820_v28  ;;  %v264_v46 = vmax.f32 %v825_v38, 0.0  ;;  %v276_v47 = vmax.f32 %v828_v39, 0.0 }
  0xf9   :  { %v843_v44 = vadd.f32 %v211_v36, %v822_v31  ;;  %v846_v45 = vadd.f32 %v241_v37, %v822_v31  ;;  %v265_v48 = vmax.f32 %v831_v40, 0.0  ;;  %v277_v49 = vmax.f32 %v834_v41, 0.0 }
  0xfa   :  { %v266_v52 = vmax.f32 %v837_v42, 0.0  ;;  %v278_v53 = vmax.f32 %v840_v43, 0.0  ;;  %v395_v39 = vunpack.c.0.s8 %v901_v21 }
  0xfb   :  { %v267_v58 = vmax.f32 %v843_v44, 0.0  ;;  %v279_v59 = vmax.f32 %v846_v45, 0.0 }
  0xfc   :  { %v948_v43 = vsub.s32 %v395_v39, %v813_v24 }
  0xfd   :  { %v215_v50 = vpop.f32.mrb[4].mxu0  ;;  %v245_v51 = vpop.f32.mrb[4].mxu1 }
  0xfe   :  { %v216_v54 = vadd.f32 %v215_v50, %v820_v28  ;;  %v856_v55 = vadd.f32 %v245_v51, %v820_v28  ;;  %v217_v56 = vpop.f32.mrb[5].mxu0  ;;  %v247_v57 = vpop.f32.mrb[5].mxu1 }
  0xff   :  { %v861_v60 = vadd.f32 %v217_v56, %v822_v31  ;;  %v864_v61 = vadd.f32 %v247_v57, %v822_v31  ;;  %v219_v62 = vpop.f32.mrb[6].mxu0  ;;  %v249_v63 = vpop.f32.mrb[6].mxu1 }
 0x100   :  { %v268_v0 = vmax.f32 %v216_v54, 0.0  ;;  %v280_v1 = vmax.f32 %v856_v55, 0.0  ;;  %v868_v2 = vadd.f32 %v219_v62, %v820_v28  ;;  %v871_v3 = vadd.f32 %v249_v63, %v820_v28  ;;  %v221_v4 = vpop.f32.mrb[7].mxu0  ;;  %v251_v5 = vpop.f32.mrb[7].mxu1 }
 0x101   :  { %v269_v6 = vmax.f32 %v861_v60, 0.0  ;;  %v281_v7 = vmax.f32 %v864_v61, 0.0  ;;  %v876_v8 = vadd.f32 %v221_v4, %v822_v31  ;;  %v879_v9 = vadd.f32 %v251_v5, %v822_v31 }
 0x102   :  { %v288_v10 = vmul.f32 %v268_v0, %v264_v46  ;;  %v456_v11 = vmul.f32 %v280_v1, %v276_v47  ;;  %v270_v12 = vmax.f32 %v868_v2, 0.0  ;;  %v282_v13 = vmax.f32 %v871_v3, 0.0 }
 0x103   :  { %v289_v14 = vmul.f32 %v269_v6, %v265_v48  ;;  %v457_v15 = vmul.f32 %v281_v7, %v277_v49  ;;  %v271_v16 = vmax.f32 %v876_v8, 0.0  ;;  %v283_v17 = vmax.f32 %v879_v9, 0.0 }
 0x104   :  { %v290_v18 = vmul.f32 %v270_v12, %v266_v52  ;;  %v458_v19 = vmul.f32 %v282_v13, %v278_v53 }
 0x105   :  { %v291_v22 = vmul.f32 %v271_v16, %v267_v58  ;;  %v459_v25 = vmul.f32 %v283_v17, %v279_v59  ;;  %v225_v26 = vpop.f32.mrb[8].mxu0  ;;  %v255_v27 = vpop.f32.mrb[8].mxu1 }
 0x106   :  { %v292_v29 = vadd.f32 %v290_v18, %v288_v10  ;;  %v460_v30 = vadd.f32 %v458_v19, %v456_v11  ;;  %v226_v32 = vadd.f32 %v225_v26, %v820_v28  ;;  %v256_v33 = vadd.f32 %v255_v27, %v820_v28  ;;  %v227_v34 = vpop.f32.mrb[9].mxu0  ;;  %v257_v35 = vpop.f32.mrb[9].mxu1 }
 0x107   :  { %v299_v36 = vadd.f32 %v291_v22, %v289_v14  ;;  %v467_v37 = vadd.f32 %v459_v25, %v457_v15  ;;  %v228_v50 = vadd.f32 %v227_v34, %v822_v31  ;;  %v258_v51 = vadd.f32 %v257_v35, %v822_v31  ;;  %v229_v54 = vpop.f32.mrb[10].mxu0  ;;  %v259_v55 = vpop.f32.mrb[10].mxu1 }
 0x108   :  { %v293_v56 = vrot.slane %v292_v29, 4  ;;  %v461_v57 = vrot.slane %v460_v30, 4  ;;  %v272_v60 = vmax.f32 %v226_v32, 0.0  ;;  %v284_v61 = vmax.f32 %v256_v33, 0.0  ;;  %v231_v62 = vpop.f32.mrb[11].mxu0  ;;  %v261_v63 = vpop.f32.mrb[11].mxu1 }
 0x109   :  { %v300_v4 = vrot.slane %v299_v36, 4  ;;  %v468_v5 = vrot.slane %v467_v37, 4  ;;  %v273_v10 = vmax.f32 %v228_v50, 0.0  ;;  %v285_v11 = vmax.f32 %v258_v51, 0.0 }
 0x10a   :  { %v294_v18 = vadd.f32 %v293_v56, %v292_v29  ;;  %v462_v19 = vadd.f32 %v461_v57, %v460_v30  ;;  %v322_v14 = vmul.f32 %v272_v60, %v268_v0  ;;  %v356_v15 = vmul.f32 %v272_v60, %v264_v46 }
 0x10b   :  { %v301_v20 = vadd.f32 %v300_v4, %v299_v36  ;;  %v469_v22 = vadd.f32 %v468_v5, %v467_v37  ;;  %v490_v25 = vmul.f32 %v284_v61, %v280_v1  ;;  %v524_v26 = vmul.f32 %v284_v61, %v276_v47 }
 0x10c   :  { %v295_v27 = vrot.slane %v294_v18, 2  ;;  %v463_v32 = vrot.slane %v462_v19, 2  ;;  %v323_v33 = vmul.f32 %v273_v10, %v269_v6  ;;  %v357_v34 = vmul.f32 %v273_v10, %v265_v48 }
 0x10d   :  { %v302_v35 = vrot.slane %v301_v20, 2  ;;  %v470_v50 = vrot.slane %v469_v22, 2  ;;  %v491_v29 = vmul.f32 %v285_v11, %v281_v7  ;;  %v525_v0 = vmul.f32 %v285_v11, %v277_v49 }
 0x10e   :  { %v296_v38 = vadd.f32 %v295_v27, %v294_v18  ;;  %v464_v46 = vadd.f32 %v463_v32, %v462_v19  ;;  %v230_v30 = vadd.f32 %v229_v54, %v820_v28  ;;  %v260_v1 = vadd.f32 %v259_v55, %v820_v28 }
 0x10f   :  { %v303_v47 = vadd.f32 %v302_v35, %v301_v20  ;;  %v471_v36 = vadd.f32 %v470_v50, %v469_v22  ;;  %v232_v7 = vadd.f32 %v231_v62, %v822_v31  ;;  %v262_v41 = vadd.f32 %v261_v63, %v822_v31 }
 0x110   :  { %v297_v6 = vrot.slane %v296_v38, 1  ;;  %v465_v37 = vrot.slane %v464_v46, 1  ;;  %v274_v40 = vmax.f32 %v230_v30, 0.0  ;;  %v286_v48 = vmax.f32 %v260_v1, 0.0 }
 0x111   :  { %v304_v51 = vrot.slane %v303_v47, 1  ;;  %v472_v56 = vrot.slane %v471_v36, 1  ;;  %v275_v3 = vmax.f32 %v232_v7, 0.0 }
 0x112   :  { %v298_v49 = vadd.f32 %v297_v6, %v296_v38  ;;  %v466_v57 = vadd.f32 %v465_v37, %v464_v46  ;;  %v324_v54 = vmul.f32 %v274_v40, %v270_v12  ;;  %v358_v28 = vmul.f32 %v274_v40, %v266_v52 }
 0x113   :  { %v305_v21 = vadd.f32 %v304_v51, %v303_v47  ;;  %v473_v55 = vadd.f32 %v472_v56, %v471_v36  ;;  %v492_v60 = vmul.f32 %v286_v48, %v282_v13  ;;  %v526_v61 = vmul.f32 %v286_v48, %v278_v53 }
 0x114   :  { %v936_v4 = vadd.f32 1e-05, %v298_v49  ;;  %v938_v62 = vadd.f32 1e-05, %v466_v57  ;;  %v326_v31 = vadd.f32 %v324_v54, %v322_v14  ;;  %v360_v63 = vadd.f32 %v358_v28, %v356_v15 }
 0x115   :  { %v940_v5 = vadd.f32 1e-05, %v305_v21  ;;  %v942_v2 = vadd.f32 1e-05, %v473_v55  ;;  %v494_v42 = vadd.f32 %v492_v60, %v490_v25  ;;  %v528_v52 = vadd.f32 %v526_v61, %v524_v26 }
 0x116   :  { %700 = vrsqrt.f32 %v936_v4  ;;  %v287_v12 = vmax.f32 %v262_v41, 0.0  ;;  %v313_v53 = vand.u32 2147483648, %v936_v4  ;;  %vm310_vm0 = vcmp.eq.f32.partialorder %v936_v4, inf }
 0x117   :  { %702 = vrsqrt.f32 %v938_v62  ;;  %v327_v13 = vrot.slane %v326_v31, 4  ;;  %v361_v10 = vrot.slane %v360_v63, 4  ;;  %v495_v11 = vrot.slane %v494_v42, 4 }
 0x118   :  { %704 = vrsqrt.f32 %v940_v5  ;;  %v529_v18 = vrot.slane %v528_v52, 4  ;;  %vm312_vm1 = vcmp.eq.f32.partialorder %v936_v4, 0.0  ;;  %vm478_vm2 = vcmp.eq.f32.partialorder %v938_v62, inf }
 0x119   :  { %706 = vrsqrt.f32 %v942_v2  ;;  %v325_v19 = vmul.f32 %v275_v3, %v271_v16  ;;  %v359_v24 = vmul.f32 %v275_v3, %v267_v58  ;;  %v493_v14 = vmul.f32 %v287_v12, %v283_v17 }
 0x11a   :  { %v527_v15 = vmul.f32 %v287_v12, %v279_v59  ;;  %v328_v20 = vadd.f32 %v327_v13, %v326_v31  ;;  %v362_v22 = vadd.f32 %v361_v10, %v360_v63  ;;  %v496_v25 = vadd.f32 %v495_v11, %v494_v42 }
 0x11b   :  { %v530_v26 = vadd.f32 %v529_v18, %v528_v52  ;;  %v333_v27 = vadd.f32 %v325_v19, %v323_v33  ;;  %v367_v32 = vadd.f32 %v359_v24, %v357_v34  ;;  %v501_v35 = vadd.f32 %v493_v14, %v491_v29 }
 0x11c   :  { %v963_v50 = vadd.f32 %v527_v15, %v525_v0  ;;  %vm480_vm3 = vcmp.eq.f32.partialorder %v938_v62, 0.0  ;;  %v329_v8 = vrot.slane %v328_v20, 2  ;;  %v363_v44 = vrot.slane %v362_v22, 2 }
 0x11d   :  { %v497_v58 = vrot.slane %v496_v25, 2  ;;  %v481_v9 = vand.u32 2147483648, %v938_v62  ;;  %vm317_vm4 = vcmp.eq.f32.partialorder %v940_v5, inf  ;;  %v531_v45 = vrot.slane %v530_v26, 2 }
 0x11e   :  { %v334_v59 = vrot.slane %v333_v27, 4  ;;  %vm319_vm5 = vcmp.eq.f32.partialorder %v940_v5, 0.0  ;;  %v330_v17 = vadd.f32 %v329_v8, %v328_v20  ;;  %v364_v33 = vadd.f32 %v363_v44, %v362_v22 }
 0x11f   :  { %v498_v34 = vadd.f32 %v497_v58, %v496_v25  ;;  %v320_v38 = vand.u32 2147483648, %v940_v5  ;;  %vm485_vm6 = vcmp.eq.f32.partialorder %v942_v2, inf  ;;  %v488_v46 = vand.u32 2147483648, %v942_v2 }
 0x120   :  { %v701_v16 = vpop.eup %700  ;;  %v331_v39 = vrot.slane %v330_v17, 1  ;;  %v365_v47 = vrot.slane %v364_v33, 1  ;;  %v368_v36 = vrot.slane %v367_v32, 4  ;;  %v532_v48 = vadd.f32 %v531_v45, %v530_v26 }
 0x121   :  { %v703_v29 = vpop.eup %702  ;;  %v309_v0 = vmul.f32 %v701_v16, %v936_v4  ;;  %v335_v51 = vadd.f32 %v334_v59, %v333_v27  ;;  %v499_v49 = vrot.slane %v498_v34, 1  ;;  %v502_v21 = vrot.slane %v501_v35, 4 }
 0x122   :  { %v705_v30 = vpop.eup %704  ;;  %v477_v1 = vmul.f32 %v703_v29, %v938_v62  ;;  %v332_v28 = vadd.f32 %v331_v39, %v330_v17  ;;  %vm487_vm7 = vcmp.eq.f32.partialorder %v942_v2, 0.0  ;;  %v366_v61 = vadd.f32 %v365_v47, %v364_v33 }
 0x123   :  { %v707_v6 = vpop.eup %706  ;;  %v311_v37 = vsel %vm310_vm0, %v936_v4, %v309_v0  ;;  %v316_v40 = vmul.f32 %v705_v30, %v940_v5  ;;  %v500_v42 = vadd.f32 %v499_v49, %v498_v34  ;;  %v336_v52 = vrot.slane %v335_v51, 2 }
 0x124   :  { %v314_v56 = vsel %vm312_vm1, %v313_v53, %v311_v37  ;;  %v479_v7 = vsel %vm478_vm2, %v938_v62, %v477_v1  ;;  %v484_v41 = vmul.f32 %v707_v6, %v942_v2  ;;  %v533_v62 = vrot.slane %v532_v48, 1 }
 0x125   :  { %v482_v57 = vsel %vm480_vm3, %v481_v9, %v479_v7  ;;  %v318_v54 = vsel %vm317_vm4, %v940_v5, %v316_v40  ;;  %v369_v3 = vadd.f32 %v368_v36, %v367_v32  ;;  %v996_v53 = vadd.f32 1e-05, %v332_v28 }
 0x126   :  { %v321_v55 = vsel %vm319_vm5, %v320_v38, %v318_v54  ;;  %v486_v60 = vsel %vm485_vm6, %v942_v2, %v484_v41  ;;  %v503_v5 = vadd.f32 %v502_v21, %v501_v35  ;;  %v536_v13 = vrot.slane %v963_v50, 4 }
 0x127   :  { %v392_v4 = vcombine.low %v314_v56, %v321_v55  ;;  %v489_v31 = vsel %vm487_vm7, %v488_v46, %v486_v60  ;;  %v1005_v11 = vadd.f32 1e-05, %v366_v61  ;;  %v534_v19 = vadd.f32 %v533_v62, %v532_v48 }
 0x128   :  { %v560_v63 = vcombine.low %v482_v57, %v489_v31  ;;  %v1009_v14 = vadd.f32 1e-05, %v500_v42  ;;  %v337_v15 = vadd.f32 %v336_v52, %v335_v51  ;;  %v370_v20 = vrot.slane %v369_v3, 2 }
 0x129   :  { %v399_v12 = vrot.slane %v392_v4, %v948_v43  ;;  %708 = vrsqrt.f32 %v996_v53  ;;  %v504_v23 = vrot.slane %v503_v5, 2  ;;  %v537_v22 = vadd.f32 %v536_v13, %v963_v50 }
 0x12a   :  { %v567_v2 = vrot.slane %v560_v63, %v948_v43  ;;  %710 = vrsqrt.f32 %v1005_v11  ;;  %v338_v25 = vrot.slane %v337_v15, 1  ;;  %v371_v26 = vadd.f32 %v370_v20, %v369_v3 }
 0x12b   :  { %v406_v18 = vrot.slane %v399_v12, %v948_v43  ;;  %v505_v27 = vadd.f32 %v504_v23, %v503_v5  ;;  %v538_v32 = vrot.slane %v537_v22, 2  ;;  %712 = vrsqrt.f32 %v1009_v14 }
 0x12c   :  { %v574_v24 = vrot.slane %v567_v2, %v948_v43  ;;  %v1025_v35 = vadd.f32 1e-05, %v534_v19  ;;  %v339_v8 = vadd.f32 %v338_v25, %v337_v15  ;;  %v372_v44 = vrot.slane %v371_v26, 1 }
 0x12d   :  { %412 = vst.msk [vmem:[%s1083_s3] ss:$8 sm:$0x3] %vm1000_vm8, %v406_v18  ;;  %v506_v58 = vrot.slane %v505_v27, 1  ;;  %v539_v50 = vadd.f32 %v538_v32, %v537_v22  ;;  %vm344_vm9 = vcmp.eq.f32.partialorder %v996_v53, inf  ;;  %vm346_vm10 = vcmp.eq.f32.partialorder %v996_v53, 0.0 }
 0x12e   :  { %649 = vst.msk [vmem:[%s1083_s3 + $0x3] ss:$8 sm:$0x3] %vm1000_vm8, %v574_v24  ;;  %v341_v9 = vadd.f32 1e-05, %v339_v8  ;;  %v373_v45 = vadd.f32 %v372_v44, %v371_v26  ;;  %714 = vrsqrt.f32 %v1025_v35  ;;  %v347_v37 = vand.u32 2147483648, %v996_v53 }
 0x12f   :  { %v507_v59 = vadd.f32 %v506_v58, %v505_v27  ;;  %v540_v16 = vrot.slane %v539_v50, 1  ;;  %vm378_vm11 = vcmp.eq.f32.partialorder %v1005_v11, inf  ;;  %vm380_vm12 = vcmp.eq.f32.partialorder %v1005_v11, 0.0 }
 0x130   :  { %716 = vrsqrt.f32 %v341_v9  ;;  %v375_v33 = vadd.f32 1e-05, %v373_v45  ;;  %v381_v40 = vand.u32 2147483648, %v1005_v11  ;;  %vm512_vm13 = vcmp.eq.f32.partialorder %v1009_v14, inf }
 0x131   :  { %v509_v34 = vadd.f32 1e-05, %v507_v59  ;;  %v541_v0 = vadd.f32 %v540_v16, %v539_v50  ;;  %vm514_vm14 = vcmp.eq.f32.partialorder %v1009_v14, 0.0  ;;  %vm351_vm15 = vcmp.eq.f32.partialorder %v341_v9, inf }
 0x132   :  { %718 = vrsqrt.f32 %v375_v33  ;;  %v354_v41 = vand.u32 2147483648, %v341_v9  ;;  %v515_v49 = vand.u32 2147483648, %v1009_v14  ;;  %vm353_vm0 = vcmp.eq.f32.partialorder %v341_v9, 0.0 }
 0x133   :  { %v709_v17 = vpop.eup %708  ;;  %720 = vrsqrt.f32 %v509_v34  ;;  %v543_v30 = vadd.f32 1e-05, %v541_v0  ;;  %vm546_vm1 = vcmp.eq.f32.partialorder %v1025_v35, inf  ;;  %vm548_vm2 = vcmp.eq.f32.partialorder %v1025_v35, 0.0 }
 0x134   :  { %v711_v29 = vpop.eup %710  ;;  %v343_v46 = vmul.f32 %v709_v17, %v996_v53  ;;  %vm385_vm3 = vcmp.eq.f32.partialorder %v375_v33, inf  ;;  %vm387_vm4 = vcmp.eq.f32.partialorder %v375_v33, 0.0  ;;  %v388_v62 = vand.u32 2147483648, %v375_v33 }
 0x135   :  { %v713_v38 = vpop.eup %712  ;;  %v377_v1 = vmul.f32 %v711_v29, %v1005_v11  ;;  %722 = vrsqrt.f32 %v543_v30  ;;  %vm519_vm5 = vcmp.eq.f32.partialorder %v509_v34, inf  ;;  %v522_v12 = vand.u32 2147483648, %v509_v34 }
 0x136   :  { %v511_v39 = vmul.f32 %v713_v38, %v1009_v14  ;;  %v345_v36 = vsel %vm344_vm9, %v996_v53, %v343_v46  ;;  %v549_v5 = vand.u32 2147483648, %v1025_v35  ;;  %vm521_vm6 = vcmp.eq.f32.partialorder %v509_v34, 0.0 }
 0x137   :  { %v379_v48 = vsel %vm378_vm11, %v1005_v11, %v377_v1  ;;  %v348_v56 = vsel %vm346_vm10, %v347_v37, %v345_v36  ;;  %vm553_vm7 = vcmp.eq.f32.partialorder %v543_v30, inf  ;;  %v556_v15 = vand.u32 2147483648, %v543_v30 }
 0x138   :  { %v715_v47 = vpop.eup %714  ;;  %v513_v7 = vsel %vm512_vm13, %v1009_v14, %v511_v39  ;;  %v382_v21 = vsel %vm380_vm12, %v381_v40, %v379_v48  ;;  %vm555_vm9 = vcmp.eq.f32.partialorder %v543_v30, 0.0 }
 0x139   :  { %v545_v57 = vmul.f32 %v715_v47, %v1025_v35  ;;  %v516_v61 = vsel %vm514_vm14, %v515_v49, %v513_v7 }
 0x13a   :  { %v717_v6 = vpop.eup %716 }
 0x13b   :  { %v350_v51 = vmul.f32 %v717_v6, %v341_v9  ;;  %v547_v42 = vsel %vm546_vm1, %v1025_v35, %v545_v57 }
 0x13c   :  { %v719_v28 = vpop.eup %718  ;;  %v550_v14 = vsel %vm548_vm2, %v549_v5, %v547_v42 }
 0x13d   :  { %v352_v54 = vsel %vm351_vm15, %v341_v9, %v350_v51  ;;  %v721_v60 = vpop.eup %720  ;;  %v384_v4 = vmul.f32 %v719_v28, %v375_v33 }
 0x13e   :  { %v355_v55 = vsel %vm353_vm0, %v354_v41, %v352_v54  ;;  %v518_v63 = vmul.f32 %v721_v60, %v509_v34 }
 0x13f   :  { %v416_v31 = vcombine.low %v348_v56, %v355_v55  ;;  %v386_v52 = vsel %vm385_vm3, %v375_v33, %v384_v4  ;;  %v723_v53 = vpop.eup %722 }
 0x140   :  { %v389_v13 = vsel %vm387_vm4, %v388_v62, %v386_v52  ;;  %v520_v2 = vsel %vm519_vm5, %v509_v34, %v518_v63  ;;  %v552_v24 = vmul.f32 %v723_v53, %v543_v30 }
 0x141   :  { %v423_v3 = vrot.slane %v416_v31, %v948_v43  ;;  %v437_v18 = vcombine.low %v382_v21, %v389_v13  ;;  %v523_v19 = vsel %vm521_vm6, %v522_v12, %v520_v2 }
 0x142   :  { %v581_v20 = vcombine.low %v516_v61, %v523_v19  ;;  %v554_v22 = vsel %vm553_vm7, %v543_v30, %v552_v24 }
 0x143   :  { %v430_v11 = vrot.slane %v423_v3, %v948_v43  ;;  %v444_v23 = vrot.slane %v437_v18, %v948_v43  ;;  %v557_v25 = vsel %vm555_vm9, %v556_v15, %v554_v22 }
 0x144   :  { %v588_v26 = vrot.slane %v581_v20, %v948_v43  ;;  %v602_v32 = vcombine.low %v550_v14, %v557_v25 }
 0x145   :  { %647 = vst.msk [vmem:[%s1083_s3 + $0x1] ss:$8 sm:$0x3] %vm1000_vm8, %v430_v11  ;;  %v451_v27 = vrot.slane %v444_v23, %v948_v43 }
 0x146   :  { %v595_v35 = vrot.slane %v588_v26, %v948_v43  ;;  %v609_v8 = vrot.slane %v602_v32, %v948_v43 }
 0x147   :  { %648 = vst.msk [vmem:[%s1083_s3 + $0x2] ss:$8 sm:$0x3] %vm1000_vm8, %v451_v27 }
 0x148   :  { %650 = vst.msk [vmem:[%s1083_s3 + $0x4] ss:$8 sm:$0x3] %vm1000_vm8, %v595_v35  ;;  %v616_v44 = vrot.slane %v609_v8, %v948_v43 }
 0x14a   :  { %651 = vst.msk [vmem:[%s1083_s3 + $0x5] ss:$8 sm:$0x3] %vm1000_vm8, %v616_v44 }

</bundles_post_ra>
